<compile_context>
chip_gen: v6e
topology: v6e:2x2x1
jax: 0.10.0
libtpu: 0.0.40
codegen_flags: <defaults>
</compile_context>

<pallas_src>
import functools
import math

import jax
import jax.numpy as jnp
from jax import lax
from jax.experimental import pallas as pl
from jax.experimental.pallas import tpu as pltpu


# --------------------------------------------------------------------------
# Kernels
# --------------------------------------------------------------------------
def _attn_2d_kernel(q_ref, k_ref, v_ref, o_ref, *, scale, prescale_q):
    """One (squeezed) batch element per grid step: refs are 2-D tiles."""
    q = q_ref[...]                       # [Tq, D]
    k = k_ref[...]                       # [Tk, D]
    v = v_ref[...]                       # [Tk, Dv]

    if prescale_q:
        q = q * scale                    # cheaper when D <= Tk

    # 'qd,kd->qk' without materializing k.T (no XLU transpose / relayout).
    energy = lax.dot_general(
        q, k,
        dimension_numbers=(((1,), (1,)), ((), ())),
        preferred_element_type=jnp.float32)            # [Tq, Tk] f32

    if not prescale_q:
        energy = energy * scale          # cheaper when Tk < D (this module)

    m = jnp.max(energy, axis=-1, keepdims=True)
    e = jnp.exp(energy - m)
    denom = jnp.sum(e, axis=-1, keepdims=True)
    probs = e * pl.reciprocal(denom, approx=True)       # EUP vrcp

    out = jnp.dot(probs.astype(v.dtype), v, preferred_element_type=jnp.float32)
    o_ref[...] = out.astype(o_ref.dtype)


def _attn_batched_kernel(q_ref, k_ref, v_ref, o_ref, *, scale, prescale_q):
    """Batch-folded variant: several batch elements per grid step."""
    q = q_ref[...]                       # [bb, Tq, D]
    k = k_ref[...]                       # [bb, Tk, D]
    v = v_ref[...]                       # [bb, Tk, Dv]

    if prescale_q:
        q = q * scale

    energy = jnp.einsum("bqd,bkd->bqk", q, k,
                        preferred_element_type=jnp.float32)   # [bb, Tq, Tk]

    if not prescale_q:
        energy = energy * scale

    m = jnp.max(energy, axis=-1, keepdims=True)
    e = jnp.exp(energy - m)
    denom = jnp.sum(e, axis=-1, keepdims=True)
    probs = e * pl.reciprocal(denom, approx=True)

    out = jnp.einsum("bqk,bkd->bqd", probs.astype(v.dtype), v,
                     preferred_element_type=jnp.float32)
    o_ref[...] = out.astype(o_ref.dtype)


# --------------------------------------------------------------------------
# Wrapper
# --------------------------------------------------------------------------
def _choose_batch_block(B, Tq, Tk, D, Dv, itemsize):
    """Fold small batches per grid step, keep >=2 steps for v7x's 2 TCs,
    and stay inside a conservative VMEM budget for the double-buffered tiles."""
    budget = 12 * 2 ** 20
    best = 1
    for bb in range(1, min(B, 8) + 1):
        if B % bb != 0:
            continue
        if B > 1 and B // bb < 2:        # keep both TensorCores busy on v7x
            continue
        tile_bytes = bb * ((Tq * D + Tk * D + Tk * Dv + Tq * Dv) * itemsize
                           + Tq * Tk * 4)
        if 2 * tile_bytes > budget:      # double-buffered by the pipeline
            continue
        best = bb
    return best


def attention(query, keys, values, *, batch_block=None):
    """Pallas equivalent of Attention.forward(query, keys, values)."""
    B, Tq, D = query.shape
    Bk, Tk, Dk = keys.shape
    Bv, Tkv, Dv = values.shape
    assert B == Bk == Bv and D == Dk and Tk == Tkv

    # Matches Attention(query_dim=attention_size) where attention_size = H*W.
    scale = 1.0 / math.sqrt(D)
    # Scale whichever operand is smaller (for this module D = H*W >> Tk=C,
    # so scaling the [Tq,Tk] score tile is the cheaper VPU path).
    prescale_q = D <= Tk

    itemsize = jnp.dtype(query.dtype).itemsize
    if batch_block is None:
        batch_block = _choose_batch_block(B, Tq, Tk, D, Dv, itemsize)
    bb = batch_block
    assert B % bb == 0
    grid = (B // bb,)

    if bb == 1:
        kernel = functools.partial(_attn_2d_kernel,
                                   scale=scale, prescale_q=prescale_q)
        # Squeezed leading batch dim -> clean 2-D (sublane, lane) tiles.
        in_specs = [
            pl.BlockSpec((None, Tq, D), lambda b: (b, 0, 0)),
            pl.BlockSpec((None, Tk, D), lambda b: (b, 0, 0)),
            pl.BlockSpec((None, Tk, Dv), lambda b: (b, 0, 0)),
        ]
        out_specs = pl.BlockSpec((None, Tq, Dv), lambda b: (b, 0, 0))
    else:
        kernel = functools.partial(_attn_batched_kernel,
                                   scale=scale, prescale_q=prescale_q)
        in_specs = [
            pl.BlockSpec((bb, Tq, D), lambda b: (b, 0, 0)),
            pl.BlockSpec((bb, Tk, D), lambda b: (b, 0, 0)),
            pl.BlockSpec((bb, Tk, Dv), lambda b: (b, 0, 0)),
        ]
        out_specs = pl.BlockSpec((bb, Tq, Dv), lambda b: (b, 0, 0))

    # Raise scoped VMEM only when the tiles actually need it; cap with
    # headroom below the smallest physical VMEM (v7x = 64 MiB per TC).
    tile_bytes = bb * (Tq * D + Tk * D + Tk * Dv + Tq * Dv) * itemsize
    score_bytes = bb * Tq * Tk * 4
    vmem_needed = 2 * tile_bytes + 3 * score_bytes
    vmem_limit = None
    if vmem_needed > 24 * 2 ** 20:
        vmem_limit = min(int(vmem_needed * 5 // 4), 48 * 2 ** 20)

    return pl.pallas_call(
        kernel,
        out_shape=jax.ShapeDtypeStruct((B, Tq, Dv), query.dtype),
        grid_spec=pltpu.PrefetchScalarGridSpec(
            num_scalar_prefetch=0,
            grid=grid,
            in_specs=in_specs,
            out_specs=out_specs,
        ),
        compiler_params=pltpu.CompilerParams(
            dimension_semantics=("parallel",),
            vmem_limit_bytes=vmem_limit,
        ),
    )(query, keys, values)


# --------------------------------------------------------------------------
# Reference + test
# --------------------------------------------------------------------------
def _reference(query, keys, values):
    scale = 1.0 / math.sqrt(query.shape[-1])
    energy = jnp.einsum("bqd,bkd->bqk", query, keys) * scale
    probs = jax.nn.softmax(energy, axis=2)
    return jnp.einsum("bqk,bkd->bqd", probs, values)


if __name__ == "__main__":
    root = jax.random.PRNGKey(0)

    def run_case(B, C, HW, dtype=jnp.float32):
        kq, kk, kv = jax.random.split(jax.random.fold_in(root, B * 1000 + C), 3)
        query = jax.random.normal(kq, (B, C, HW), dtype=dtype)
        keys = jax.random.normal(kk, (B, C, HW), dtype=dtype)
        values = jax.random.normal(kv, (B, C, HW), dtype=dtype)

        out = jax.block_until_ready(attention(query, keys, values))
        ref = _reference(query, keys, values)

        assert out.shape == (B, C, HW)
        # Slightly relaxed tolerance: approx (EUP) reciprocal in the softmax.
        assert jnp.allclose(out, ref, atol=5e-3, rtol=5e-3), \
            float(jnp.max(jnp.abs(out - ref)))
        return out

    # Small shapes consistent with ConvLSTMCell's use of Attention:
    # feature maps [B, C, H, W] flattened to [B, C, H*W].
    run_case(B=2, C=8, HW=16 * 16)   # bb=1 -> squeezed 2-D kernel path
    run_case(B=8, C=8, HW=128)       # bb=4 -> batch-folded kernel path

    print("KERNEL_OK")
</pallas_src>

<mosaic_0001>
module attributes {stable_mosaic.version = 11 : i64} {
  func.func @_attn_2d_kernel(%arg0: i32, %arg1: memref<1x8x256xf32, #tpu.memory_space<vmem>>, %arg2: memref<1x8x256xf32, #tpu.memory_space<vmem>>, %arg3: memref<1x8x256xf32, #tpu.memory_space<vmem>>, %arg4: memref<1x8x256xf32, #tpu.memory_space<vmem>>) attributes {dimension_semantics = [#tpu.dimension_semantics<parallel>], iteration_bounds = array<i64: 2>, scalar_prefetch = 0 : i64, scratch_operands = 0 : i64, tpu.core_type = #tpu.core_type<tc>, window_params = [{transform_indices = @transform_0, window_bounds = array<i64: 1, 8, 256>}, {transform_indices = @transform_1, window_bounds = array<i64: 1, 8, 256>}, {transform_indices = @transform_2, window_bounds = array<i64: 1, 8, 256>}, {transform_indices = @transform_3, window_bounds = array<i64: 1, 8, 256>}]} {
    %c0 = arith.constant 0 : index
    %c0_0 = arith.constant 0 : index
    %c0_1 = arith.constant 0 : index
    %0 = vector.load %arg1[%c0, %c0_0, %c0_1] : memref<1x8x256xf32, #tpu.memory_space<vmem>>, vector<1x8x256xf32>
    %1 = vector.shape_cast %0 : vector<1x8x256xf32> to vector<8x256xf32>
    %c0_2 = arith.constant 0 : index
    %c0_3 = arith.constant 0 : index
    %c0_4 = arith.constant 0 : index
    %2 = vector.load %arg2[%c0_2, %c0_3, %c0_4] : memref<1x8x256xf32, #tpu.memory_space<vmem>>, vector<1x8x256xf32>
    %3 = vector.shape_cast %2 : vector<1x8x256xf32> to vector<8x256xf32>
    %c0_5 = arith.constant 0 : index
    %c0_6 = arith.constant 0 : index
    %c0_7 = arith.constant 0 : index
    %4 = vector.load %arg3[%c0_5, %c0_6, %c0_7] : memref<1x8x256xf32, #tpu.memory_space<vmem>>, vector<1x8x256xf32>
    %5 = vector.shape_cast %4 : vector<1x8x256xf32> to vector<8x256xf32>
    %cst = arith.constant dense<0.000000e+00> : vector<8x8xf32>
    %6 = tpu.matmul %1, %3, %cst {dimension_numbers = #tpu.dot_dimension_numbers<[1], [1], [0], [0], [0, 0, 1, 0], [], []>} : vector<8x256xf32>, vector<8x256xf32>, vector<8x8xf32> -> vector<8x8xf32>
    %cst_8 = arith.constant 6.250000e-02 : f32
    %7 = vector.broadcast %cst_8 : f32 to vector<8x8xf32>
    %8 = arith.mulf %6, %7 : vector<8x8xf32>
    %cst_9 = arith.constant dense<0xFF800000> : vector<8xf32>
    %9 = vector.multi_reduction <maximumf>, %8, %cst_9 [1] : vector<8x8xf32> to vector<8xf32>
    %10 = vector.shape_cast %9 : vector<8xf32> to vector<8x1xf32>
    %11 = vector.broadcast %10 : vector<8x1xf32> to vector<8x8xf32>
    %12 = arith.subf %8, %11 : vector<8x8xf32>
    %13 = math.exp %12 : vector<8x8xf32>
    %cst_10 = arith.constant dense<0.000000e+00> : vector<8xf32>
    %14 = vector.multi_reduction <add>, %13, %cst_10 [1] : vector<8x8xf32> to vector<8xf32>
    %15 = vector.shape_cast %14 : vector<8xf32> to vector<8x1xf32>
    %16 = tpu.reciprocal %15 {approx = true} : vector<8x1xf32> -> vector<8x1xf32>
    %17 = vector.broadcast %16 : vector<8x1xf32> to vector<8x8xf32>
    %18 = arith.mulf %13, %17 : vector<8x8xf32>
    %cst_11 = arith.constant dense<0.000000e+00> : vector<8x256xf32>
    %19 = tpu.matmul %18, %5, %cst_11 {dimension_numbers = #tpu.dot_dimension_numbers<[1], [0], [0], [1], [0, 0, 1, 1], [], []>} : vector<8x8xf32>, vector<8x256xf32>, vector<8x256xf32> -> vector<8x256xf32>
    %c0_12 = arith.constant 0 : index
    %c0_13 = arith.constant 0 : index
    %c0_14 = arith.constant 0 : index
    %20 = vector.load %arg4[%c0_12, %c0_13, %c0_14] : memref<1x8x256xf32, #tpu.memory_space<vmem>>, vector<1x8x256xf32>
    %21 = vector.shape_cast %20 : vector<1x8x256xf32> to vector<8x256xf32>
    %22 = vector.shape_cast %19 : vector<8x256xf32> to vector<1x8x256xf32>
    tpu.vector_store %arg4[%c0_12, %c0_13, %c0_14], %22 {strides = array<i32>} : memref<1x8x256xf32, #tpu.memory_space<vmem>>, vector<1x8x256xf32>,
    return
  }
  func.func @transform_0(%arg0: i32) -> (i32, i32, i32) {
    %c0_i32 = arith.constant 0 : i32
    %c0_i32_0 = arith.constant 0 : i32
    %c0_i32_1 = arith.constant 0 : i32
    return %arg0, %c0_i32, %c0_i32_0 : i32, i32, i32
  }
  func.func @transform_1(%arg0: i32) -> (i32, i32, i32) {
    %c0_i32 = arith.constant 0 : i32
    %c0_i32_0 = arith.constant 0 : i32
    %c0_i32_1 = arith.constant 0 : i32
    return %arg0, %c0_i32, %c0_i32_0 : i32, i32, i32
  }
  func.func @transform_2(%arg0: i32) -> (i32, i32, i32) {
    %c0_i32 = arith.constant 0 : i32
    %c0_i32_0 = arith.constant 0 : i32
    %c0_i32_1 = arith.constant 0 : i32
    return %arg0, %c0_i32, %c0_i32_0 : i32, i32, i32
  }
  func.func @transform_3(%arg0: i32) -> (i32, i32, i32) {
    %c0_i32 = arith.constant 0 : i32
    %c0_i32_0 = arith.constant 0 : i32
    %c0_i32_1 = arith.constant 0 : i32
    return %arg0, %c0_i32, %c0_i32_0 : i32, i32, i32
  }
}

</mosaic_0001>

<bundles_post_ra>
// kernel: tpu_custom_call.1
= control target key start
LH: loop header
LB: loop body
LE: loop exit
PB: predicated region body
PF: predicated region fallthrough
CT: control target
= control target key end

     0   :  { %s1036_s0 = inlined_call_operand.hbm [shape: f32[2,8,256], index: 0, kind: input, shape index: {}]   ;;  %s1037_s1 = inlined_call_operand.hbm [shape: f32[2,8,256], index: 1, kind: input, shape index: {}]   ;;  %s1038_s2 = inlined_call_operand.hbm [shape: f32[2,8,256], index: 2, kind: input, shape index: {}]   ;;  %s1039_s3 = inlined_call_operand.hbm [shape: f32[2,8,256], index: 3, kind: output, shape index: {}]  }
   0x1   :  { %1043 = sst [smem:[#allocation13_spill]] %s1036_s0 }
   0x2   :  { %1044 = sst [smem:[#allocation14_spill]] %s1037_s1 }
   0x3   :  { %8 = vsyncpa [#allocation3], 0 }
   0x4   :  { %10 = vsyncpa [#allocation3 + $0x1], 0 }
   0x5   :  { %11 = vsyncpa [#allocation6], 0 }
   0x6   :  { %13 = vsyncpa [#allocation6 + $0x1], 0 }
   0x7   :  { %14 = vsyncpa [#allocation4], 0 }
   0x8   :  { %16 = vsyncpa [#allocation4 + $0x1], 0  ;;  %s820_s12 = smov 0   ;;  %s822_s13 = smov 0  }
   0x9   :  { %s824_s14 = smov 0   ;;  %s826_s15 = smov 0  }
   0xa LB: > { %s841_s16 = sadd.s32 4294967295, %s793_s15   ;;  %s553_s17 = sadd.s32 4294967294, %s793_s15   ;;  %s793_s15 = sphi %s826_s15, %s1065_s15   ;;  %s789_s14 = sphi %s824_s14, %s1064_s14   ;;  %s785_s13 = sphi %s822_s13, %s1063_s13   ;;  %s781_s12 = sphi %s820_s12, %s1062_s12  }
   0xb   : > { %s845_s18 = sadd.s32 1, %s793_s15   ;;  %s29_s19 = sadd.s32 1, %s789_s14 }
   0xc   : > { %s26_s20 = ssub.s32 %s793_s15, %s845_s18  ;;  %p36_p0 = scmp.ne.s32.totalorder %s789_s14, %s785_s13 }
   0xd   : > { %p27_p1 = scmp.eq.s32.totalorder %s26_s20, 0  ;;  %p37_p2 = scmp.eq.s32.totalorder %s793_s15, 0 }
   0xe   : > { %p42_p3 = scmp.ne.s32.totalorder %s785_s13, %s781_s12  ;;  %p43_p4 = scmp.eq.s32.totalorder %s841_s16, 0 }
   0xf   : > { %s857_s21 = scalar_select %p27_p1, %s789_s14, %s29_s19  }
  0x10   : > { %p38_p5 = por %p37_p2, %p36_p0  ;;  %p859_p6 = por %p43_p4, %p42_p3 }
  0x11   : > { %1045 = sst [smem:[#allocation12_spill]] %s857_s21  ;;  %p118_p7 = scmp.eq.s32.totalorder %s841_s16, 1 }
  0x12   : > { %s1046_s22 = scalar_select %p859_p6, 1, 0 }
  0x13   : > { %p124_p8 = scmp.eq.s32.totalorder %s553_s17, 1  ;;  %p602_p10 = scmp.lt.s32.totalorder %s793_s15, 2 }
  0x14   : > { %p866_p11 = por %p118_p7, %p36_p0  ;;  %s1040_s25 = sand.u32 1, %s789_s14  }
  0x15   : > { %p870_p12 = por %p124_p8, %p42_p3  ;;  %s876_s26 = sshll.u32 %s793_s15, 8 }
  0x16   : > { %s1047_s23 = scalar_select %p866_p11, 1, 0 }
  0x17   : > { %s1048_s24 = scalar_select %p870_p12, 1, 0 }
  0x18   : > { %s880_s27 = sshll.u32 %s1040_s25, 4  ;;  %p882_p13 = pnand %p602_p10, %p38_p5 }
  0x19   : > { %s163_s29 = sand.u32 1, %s793_s15   ;;  %s1050_s1 = sld [smem:[#allocation14_spill]] }
  0x1a   : > { %s167_s6 = scalar_lea.vmem [#allocation5], %s880_s27  ;;  %s895_s8 = scalar_lea.sflag [#allocation6], %s163_s29 }
  0x1b   : > { %s175_s7 = sshll.u32 %s167_s6, 4  ;;  %p901_p2 = pneg %p882_p13  ;;  %s176_s7 = int_to_ptr.vmem [resolvable:$true] %s175_s7 }
  0x1f   : > { %s891_s5 = scalar_lea.hbm %s1050_s1, %s876_s26  ;;  %s646_s19 = scalar_lea.hbm %s1050_s1, 512 }
  0x20   : > { %s641_s9 = scalar_lea.hbm %s891_s5, 256  ;;  %p647_p5 = scmp.lt.s32.totalorder %s891_s5, %s1050_s1 }
  0x21   : > { %p642_p1 = scmp.ne.s32.totalorder %s891_s5, %s641_s9  ;;  %p648_p7 = scmp.lt.s32.totalorder %s646_s19, %s641_s9 }
  0x23   : > { %p644_p3 = pnand %p901_p2, %p642_p1  ;;  %p649_p8 = por %p648_p7, %p647_p5 }
  0x25   : > { %p645_p4 = pneg %p644_p3 }
  0x27   : > { %p650_p10 = pnand %p649_p8, %p645_p4 }
  0x29   : > { %653 = shalt.err (!%p650_p10)
}
  0x2a   : > { %s654_s29 = scalar_lea.vmem %s176_s7, 256  ;;  %s795_s4 = smov [#allocation5]  }
  0x2b   : > { %p655_p9 = scmp.ne.s32.totalorder %s176_s7, %s654_s29  ;;  %s659_s6 = sshll.u32 %s795_s4, 4  ;;  %s660_s6 = int_to_ptr.vmem [resolvable:$false] %s659_s6 }
  0x2c   : > { %s661_s25 = scalar_lea.vmem %s660_s6, 512  ;;  %p662_p1 = scmp.lt.s32.totalorder %s176_s7, %s660_s6 }
  0x2d   : > { %p657_p0 = pnand %p655_p9, %p901_p2  ;;  %p663_p3 = scmp.lt.s32.totalorder %s661_s25, %s654_s29 }
  0x2f   : > { %p658_p12 = pneg %p657_p0  ;;  %p664_p11 = por %p663_p3, %p662_p1 }
  0x31   : > { %p665_p6 = pnand %p664_p11, %p658_p12 }
  0x33   : > { %668 = shalt.err (!%p665_p6)
}
  0x34   : > { %594 = dma.hbm_to_vmem [thread:$0]  (!%p882_p13), %s891_s5, 256, %s176_s7, %s895_s8  }
  0x35   : > { %p199_p9 = scmp.lt.s32.totalorder %s793_s15, 3  ;;  %s1052_s0 = sld [smem:[#allocation13_spill]] }
  0x36   : > { %p1053_p0 = scmp.ge.s32.totalorder %s793_s15, 1  ;;  %s148_s19 = scalar_lea.vmem [#allocation2], %s880_s27 }
  0x37   : > { %s156_s20 = sshll.u32 %s148_s19, 4  ;;  %s1055_s30 = sand.u32 1, %s789_s14   ;;  %s157_s20 = int_to_ptr.vmem [resolvable:$true] %s156_s20 }
  0x38   : > { %p929_p6 = pnand %p1053_p0, %p199_p9  ;;  %s145_s29 = scalar_lea.sflag [#allocation3], %s1055_s30 }
  0x3a   : > { %s1054_s25 = scalar_select %p929_p6, 1, 0 }
  0x3b   : > { %s925_s17 = scalar_lea.hbm %s1052_s0, %s876_s26  ;;  %s674_s6 = scalar_lea.hbm %s1052_s0, 512 }
  0x3c   : > { %s669_s5 = scalar_lea.hbm %s925_s17, 256  ;;  %p675_p5 = scmp.lt.s32.totalorder %s925_s17, %s1052_s0 }
  0x3d   : > { %p670_p11 = scmp.ne.s32.totalorder %s925_s17, %s669_s5  ;;  %p676_p7 = scmp.lt.s32.totalorder %s674_s6, %s669_s5 }
  0x3f   : > { %p672_p12 = pnand %p670_p11, %p901_p2  ;;  %p677_p8 = por %p676_p7, %p675_p5 }
  0x41   : > { %p673_p4 = pneg %p672_p12 }
  0x43   : > { %p678_p10 = pnand %p677_p8, %p673_p4 }
  0x45   : > { %681 = shalt.err (!%p678_p10)
}
  0x46   : > { %s682_s19 = scalar_lea.vmem %s157_s20, 256  ;;  %s796_s30 = smov [#allocation2]  }
  0x47   : > { %p683_p1 = scmp.ne.s32.totalorder %s157_s20, %s682_s19  ;;  %s687_s1 = sshll.u32 %s796_s30, 4  ;;  %s688_s1 = int_to_ptr.vmem [resolvable:$false] %s687_s1 }
  0x48   : > { %s689_s21 = scalar_lea.vmem %s688_s1, 512  ;;  %p690_p0 = scmp.lt.s32.totalorder %s157_s20, %s688_s1 }
  0x49   : > { %p685_p3 = pnand %p683_p1, %p901_p2  ;;  %p691_p11 = scmp.lt.s32.totalorder %s689_s21, %s682_s19 }
  0x4b   : > { %p686_p9 = pneg %p685_p3  ;;  %p692_p12 = por %p691_p11, %p690_p0 }
  0x4d   : > { %p693_p6 = pnand %p692_p12, %p686_p9 }
  0x4f   : > { %696 = shalt.err (!%p693_p6)
}
  0x50   : > { %591 = dma.hbm_to_vmem [thread:$0]  (!%p882_p13), %s925_s17, 256, %s157_s20, %s145_s29  }
  0x51   : > { %s192_s4 = scalar_lea.hbm %s1038_s2, %s876_s26  ;;  %s186_s6 = scalar_lea.vmem [#allocation7], %s880_s27 }
  0x52   : > { %s194_s9 = sshll.u32 %s186_s6, 4  ;;  %s697_s11 = scalar_lea.hbm %s192_s4, 256  ;;  %s195_s9 = int_to_ptr.vmem [resolvable:$true] %s194_s9 }
  0x53   : > { %p698_p4 = scmp.ne.s32.totalorder %s192_s4, %s697_s11  ;;  %s702_s19 = scalar_lea.hbm %s1038_s2, 512 }
  0x54   : > { %p703_p6 = scmp.lt.s32.totalorder %s192_s4, %s1038_s2  ;;  %p704_p8 = scmp.lt.s32.totalorder %s702_s19, %s697_s11 }
  0x55   : > { %p700_p5 = pnand %p698_p4, %p901_p2 }
  0x56   : > { %p705_p10 = por %p704_p8, %p703_p6 }
  0x57   : > { %p701_p7 = pneg %p700_p5 }
  0x59   : > { %p706_p1 = pnand %p705_p10, %p701_p7 }
  0x5b   : > { %709 = shalt.err (!%p706_p1)
}
  0x5c   : > { %s710_s26 = scalar_lea.vmem %s195_s9, 256  ;;  %s797_s27 = smov [#allocation7]  }
  0x5d   : > { %p711_p3 = scmp.ne.s32.totalorder %s195_s9, %s710_s26  ;;  %s715_s17 = sshll.u32 %s797_s27, 4  ;;  %s716_s17 = int_to_ptr.vmem [resolvable:$false] %s715_s17 }
  0x5e   : > { %s717_s20 = scalar_lea.vmem %s716_s17, 512  ;;  %p718_p11 = scmp.lt.s32.totalorder %s195_s9, %s716_s17 }
  0x5f   : > { %p713_p9 = pnand %p711_p3, %p901_p2  ;;  %p719_p12 = scmp.lt.s32.totalorder %s717_s20, %s710_s26 }
  0x61   : > { %p714_p0 = pneg %p713_p9  ;;  %p720_p4 = por %p719_p12, %p718_p11 }
  0x63   : > { %p721_p5 = pnand %p720_p4, %p714_p0 }
  0x65   : > { %724 = shalt.err (!%p721_p5)
}
  0x66   : > { %597 = dma.hbm_to_vmem [thread:$0]  (!%p882_p13), %s192_s4, 256, %s195_s9, %s895_s8  }
  0x67   : > { %p1056_p7 = scmp.ne.s32.totalorder %s1054_s25, 0 }
  0x68   : > { %s973_s0 = sand.u32 (!%p1056_p7), 1, %s785_s13   ;;  %p1057_p2 = scmp.ne.s32.totalorder (!%p1056_p7), %s1046_s22, 0 }
  0x69   : > { %203 = sbr.rel (%p1056_p7) target bundleno = 834 (0x342), region = 32  ;;  %s976_s10 = sshll.u32 (!%p1056_p7), %s973_s0, 4 }
  0x6a   : > { %s206_s29 = scalar_lea.sflag (!%p1056_p7), [#allocation3], %s973_s0  ;;  %s209_s5 = scalar_lea.vmem (!%p1056_p7), [#allocation2], %s976_s10 }
  0x6e   : > { %768 = dma.done.wait (%p1057_p2), %s206_s29, 256  }
  0x6f   : > { %770 = vsyncadd (%p1057_p2), %s206_s29, 4294967040  ;;  %s214_s28 = sand.u32 1, %s841_s16   ;;  %s218_s25 = scalar_lea.vmem [#allocation5], %s976_s10 }
  0x70   : > { %s215_s8 = scalar_lea.sflag [#allocation6], %s214_s28 }
  0x71   : > { %772 = dma.done.wait (%p1057_p2), %s215_s8, 512  }
  0x72   : > { %774 = vsyncadd (%p1057_p2), %s215_s8, 4294966784  ;;  %v263_v0 = vld [vmem:[%s218_s25 + $0x8] sm:$0xff]  ;;  %v262_v1 = vld [vmem:[%s218_s25] sm:$0xff]  ;;  %vm337_vm0 = vcmask 64512   ;;  %s227_s22 = scalar_lea.vmem [#allocation7], %s976_s10  ;;  %v798_v15 = vmov 0.0  }
  0x73   : > { %v261_v2 = vld [vmem:[%s209_s5 + $0x8] sm:$0xff]  ;;  %296 = vmatprep.subr.mxu0 %v263_v0  ;;  %v260_v3 = vld [vmem:[%s209_s5] sm:$0xff]  ;;  %416 = vmatprep.mubr.f32.mxu1 %v798_v15  ;;  %s259_s7 = scalar_lea.vmem [#allocation8], %s976_s10  ;;  %s579_s6 = sshll.u32 %s841_s16, 8 }
  0x74   : > { %330 = vmatprep.mubr.f32.mxu0 %v261_v2  ;;  %297 = vmatpush1.xpose.msra.mxu0 %v262_v1  ;;  %v265_v13 = vld [vmem:[%s227_s22 + $0x8] sm:$0xff]  ;;  %v264_v14 = vld [vmem:[%s227_s22] sm:$0xff]  ;;  %s440_s4 = sshll.u32 %s259_s7, 4  ;;  %s438_s1 = scalar_lea.hbm %s1039_s3, %s579_s6  ;;  %s996_s4 = int_to_ptr.vmem [resolvable:$true] %s440_s4 }
  0x75   : > { %382 = vmatprep.subr.mxu1 %v265_v13  ;;  %s426_s21 = scalar_lea.sflag [#allocation4], %s973_s0  ;;  %s725_s19 = scalar_lea.vmem %s996_s4, 256 }
  0x76   : > { %383 = vmatpush1.msra.mxu1 %v264_v14  ;;  %p726_p13 = scmp.ne.s32.totalorder %s996_s4, %s725_s19  ;;  %p1058_p6 = scmp.ne.s32.totalorder %s1047_s23, 0 }
  0x77   : > { %331 = vmatmul.mubr.f32.vlgmr.msra.gmra.mxu0 %v260_v3  ;;  %s799_s16 = smov [#allocation8]  }
  0x78   : > { %p727_p8 = pnand %p726_p13, %p1058_p6  ;;  %s729_s30 = sshll.u32 %s799_s16, 4  ;;  %s730_s30 = int_to_ptr.vmem [resolvable:$false] %s729_s30 }
  0x79   : > { %s731_s26 = scalar_lea.vmem %s730_s30, 512  ;;  %p732_p1 = scmp.lt.s32.totalorder %s996_s4, %s730_s30 }
  0x7a   : > { %p728_p10 = pneg %p727_p8  ;;  %p733_p3 = scmp.lt.s32.totalorder %s731_s26, %s725_s19 }
  0x7c   : > { %p734_p9 = por %p733_p3, %p732_p1 }
  0x7e   : > { %p735_p0 = pnand %p734_p9, %p728_p10 }
 0x137   : > { %v332_v4 = vpop.f32.mrf.mxu0 }
 0x138   : > { %v336_v5 = vmul.f32 0.0625, %v332_v4 }
 0x139   : > { %v334_v6 = vpop.f32.mrf.mxu0 }
 0x13a   : > { %v338_v7 = vsel %vm337_vm0, %v336_v5, -inf }
 0x13b   : > { %339 = vmax.xlane.f32.xlu0 %v338_v7 }
 0x1c4   : > { %v340_v8 = vpop.xlane.xlu0 %339 }
 0x1c5   : > { %v341_v9 = vsub.f32 %v336_v5, %v340_v8 }
 0x1c7   : > { %v342_v10 = vmul.f32 1.442695, %v341_v9 }
 0x1c9   : > { %637 = vpow2.f32 %v342_v10 }
 0x1d6   : > { %v638_v11 = vpop.eup %637 }
 0x1d7   : > { %v344_v12 = vsel %vm337_vm0, %v638_v11, 0.0 }
 0x1d8   : > { %345 = vadd.xlane.f32.xlu0 %v344_v12 }
 0x261   : > { %v346_v16 = vpop.xlane.xlu0 %345 }
 0x262   : > { %639 = vrcp.f32 %v346_v16 }
 0x26f   : > { %v640_v17 = vpop.eup %639 }
 0x270   : > { %v348_v18 = vmul.f32 %v640_v17, %v638_v11 }
 0x272   : > { %570 = vmatmul.mubr.msk.f32.vlgmr.msra.gmra.mxu1 %vm337_vm0, %v348_v18 }
 0x332   : > { %v418_v19 = vpop.f32.mrf.mxu1 }
 0x333   : > { %423 = vst [vmem:[%s259_s7] sm:$0xff] %v418_v19 }
 0x334   : > { %v420_v20 = vpop.f32.mrf.mxu1 }
 0x335   : > { %424 = vst [vmem:[%s259_s7 + $0x8] sm:$0xff] %v420_v20 }
 0x336   : > { %738 = shalt.err (!%p735_p0)
}
 0x337   : > { %s739_s27 = scalar_lea.hbm %s438_s1, 256  ;;  %s743_s0 = scalar_lea.hbm %s1039_s3, 512 }
 0x338   : > { %p740_p11 = scmp.ne.s32.totalorder %s438_s1, %s739_s27  ;;  %p744_p5 = scmp.lt.s32.totalorder %s438_s1, %s1039_s3 }
 0x339   : > { %p745_p7 = scmp.lt.s32.totalorder %s743_s0, %s739_s27 }
 0x33a   : > { %p741_p12 = pnand %p740_p11, %p1058_p6 }
 0x33b   : > { %p746_p2 = por %p745_p7, %p744_p5 }
 0x33c   : > { %p742_p4 = pneg %p741_p12 }
 0x33e   : > { %p747_p13 = pnand %p746_p2, %p742_p4 }
 0x340   : > { %750 = shalt.err (!%p747_p13)
}
 0x341   : > { %586 = dma.vmem_to_hbm [thread:$0]  (%p1058_p6), %s996_s4, 256, %s438_s1, %s426_s21  }
 0x342 PF: > { %s452_s5 = sand.u32 1, %s781_s12   ;;  %p1059_p8 = scmp.ne.s32.totalorder %s1048_s24, 0 }
 0x343   : > { %p1060_p10 = scmp.ge.s32.totalorder %s793_s15, 2  ;;  %s453_s28 = scalar_lea.sflag [#allocation4], %s452_s5 }
 0x345   : > { %p599_p1 = pnand %p1060_p10, %p1059_p8 }
 0x347   : > { %p600_p3 = pneg %p599_p1 }
 0x349   : > { %776 = dma.done.wait (%p600_p3), %s453_s28, 256  }
 0x34a   : > { %778 = vsyncadd (%p600_p3), %s453_s28, 4294967040  ;;  %s1061_s8 = sld [smem:[#allocation12_spill]]  ;;  %p19_p9 = scmp.ge.s32.totalorder %s845_s18, 4  }
 0x34b   : > { %s1062_s12 = smov %s785_s13  ;;  %s1063_s13 = smov %s789_s14 }
 0x34c   : > { %s1065_s15 = smov %s845_s18  ;;  %21 = sbr.rel (!%p19_p9) target bundleno = 10 (0xa), region = 101 }
 0x350   : > { %s1064_s14 = smov %s1061_s8 }
 0x351   :  { %458 = vsyncpa [#allocation3], 1 }
 0x352   :  { %460 = vsyncpa [#allocation3 + $0x1], 1 }
 0x353   :  { %461 = vsyncpa [#allocation6], 1 }
 0x354   :  { %463 = vsyncpa [#allocation6 + $0x1], 1 }
 0x355   :  { %464 = vsyncpa [#allocation4], 1 }
 0x356   :  { %466 = vsyncpa [#allocation4 + $0x1], 1 }

</bundles_post_ra>
